<compile_context>
chip_gen: v7x
topology: tpu7x:2x2x1
jax: 0.10.0
libtpu: 0.0.40
codegen_flags: <defaults>
</compile_context>

<pallas_src>
import jax
import jax.numpy as jnp
from jax.experimental import pallas as pl
from jax.experimental.pallas import tpu as pltpu


def _round_up(x, m):
    return ((x + m - 1) // m) * m


def angle_resnet_kernel(
    s_ref, si_ref,                # (tm, c_s) each, input dtype (f32)
    w_in_ref, w_init_ref,         # (c_s, c) compute dtype
    b_cat_ref,                    # (1, c) f32  == b_in + b_initial
    w1_0_ref, b1_0_ref, w2_0_ref, b2_0_ref,
    w1_1_ref, b1_1_ref, w2_1_ref, b2_1_ref,
    w_out_ref, b_out_ref,         # (c, n_out_slab) compute dtype, (1, n_out_slab) f32
    out_ref,                      # (tm, n_out_slab) f32
):
    cdt = w_in_ref.dtype

    # ReLU in the input dtype (f32), then cast to the compute dtype for the MXU.
    s = jnp.maximum(s_ref[...], 0.0).astype(cdt)
    si = jnp.maximum(si_ref[...], 0.0).astype(cdt)

    # a = relu(s) @ W_in + relu(s_init) @ W_init + (b_in + b_init), f32 accumulation.
    a = (
        jnp.dot(s, w_in_ref[...], preferred_element_type=jnp.float32)
        + jnp.dot(si, w_init_ref[...], preferred_element_type=jnp.float32)
        + b_cat_ref[...]
    )

    # Two AngleResNetLayers: a = a + linear_2(relu(linear_1(relu(a))))
    for w1_ref, b1_ref, w2_ref, b2_ref in (
        (w1_0_ref, b1_0_ref, w2_0_ref, b2_0_ref),
        (w1_1_ref, b1_1_ref, w2_1_ref, b2_1_ref),
    ):
        h = jnp.maximum(a, 0.0).astype(cdt)
        h = jnp.dot(h, w1_ref[...], preferred_element_type=jnp.float32) + b1_ref[...]
        h = jnp.maximum(h, 0.0).astype(cdt)
        h = jnp.dot(h, w2_ref[...], preferred_element_type=jnp.float32) + b2_ref[...]
        a = a + h

    # alpha = linear_out(relu(a)); narrow (n_out_slab-wide) f32 store.
    alpha = (
        jnp.dot(jnp.maximum(a, 0.0).astype(cdt), w_out_ref[...],
                preferred_element_type=jnp.float32)
        + b_out_ref[...]
    )
    out_ref[...] = alpha.astype(out_ref.dtype)


def angle_resnet_pallas(s, s_initial, params, *, n_torsion_angles=7, tm=1024,
                        compute_dtype=jnp.bfloat16):
    """s, s_initial: (*, N_res, c_s). Returns (*, N_res, n_torsion_angles, 2) f32."""
    lead_shape = tuple(int(d) for d in s.shape[:-1])
    c_s = int(s.shape[-1])
    c = int(params["w_in"].shape[1])
    n_out = 2 * n_torsion_angles
    n_out_slab = _round_up(n_out, 8)          # 14 -> 16 lanes, narrow aligned output
    M = 1
    for d in lead_shape:
        M *= d

    s2 = s.reshape(M, c_s)                    # free reshapes (no HBM pass)
    si2 = s_initial.reshape(M, c_s)
    in_itemsize = s2.dtype.itemsize

    # --- weights: compute dtype for the MXU, f32 biases, fused input bias ---
    cdt = compute_dtype
    w_in = params["w_in"].astype(cdt)
    w_init = params["w_init"].astype(cdt)
    b_cat = (params["b_in"] + params["b_init"]).astype(jnp.float32)
    w_out = jnp.pad(params["w_out"],
                    ((0, 0), (0, n_out_slab - n_out))).astype(cdt)
    b_out = jnp.pad(params["b_out"],
                    ((0, 0), (0, n_out_slab - n_out))).astype(jnp.float32)
    weights = [
        w_in, w_init, b_cat,
        params["w1_0"].astype(cdt), params["b1_0"].astype(jnp.float32),
        params["w2_0"].astype(cdt), params["b2_0"].astype(jnp.float32),
        params["w1_1"].astype(cdt), params["b1_1"].astype(jnp.float32),
        params["w2_1"].astype(cdt), params["b2_1"].astype(jnp.float32),
        w_out, b_out,
    ]
    weight_bytes = sum(int(w.size) * w.dtype.itemsize for w in weights)

    # --- row tile: >=2 grid steps whenever M > 8 (v7x dual-TC), sublane aligned ---
    half_rows = _round_up(max(pl.cdiv(M, 2), 8), 8)
    tm_eff = max(8, _round_up(min(int(tm), half_rows), 8))

    def vmem_est(t):
        return (2 * 2 * t * c_s * in_itemsize    # double-buffered s / s_initial tiles
                + 2 * t * n_out_slab * 4         # double-buffered f32 output tile
                + 2 * weight_bytes               # weights (worst-case 2 buffers)
                + 6 * t * max(c, c_s) * 4)       # live f32 activation headroom

    while tm_eff > 8 and 2 * vmem_est(tm_eff) > 40 * 1024 * 1024:
        tm_eff = max(8, _round_up(tm_eff // 2, 8))
    grid_m = pl.cdiv(M, tm_eff)

    vmem_limit = int(min(max(2 * vmem_est(tm_eff), 8 * 1024 * 1024),
                         48 * 1024 * 1024))

    row_spec = pl.BlockSpec((tm_eff, c_s), lambda i: (i, 0))
    out_spec = pl.BlockSpec((tm_eff, n_out_slab), lambda i: (i, 0))
    weight_specs = [pl.BlockSpec(w.shape, lambda i: (0, 0)) for w in weights]

    flops = 2 * M * (2 * c_s * c + 4 * c * c + c * n_out_slab)
    bytes_accessed = 2 * M * c_s * in_itemsize + M * n_out_slab * 4 + weight_bytes
    cost = pl.CostEstimate(flops=flops, transcendentals=0,
                           bytes_accessed=bytes_accessed)

    out = pl.pallas_call(
        angle_resnet_kernel,
        out_shape=jax.ShapeDtypeStruct((M, n_out_slab), jnp.float32),
        grid_spec=pltpu.PrefetchScalarGridSpec(
            num_scalar_prefetch=0,
            grid=(grid_m,),
            in_specs=[row_spec, row_spec] + weight_specs,
            out_specs=out_spec,
        ),
        compiler_params=pltpu.CompilerParams(
            dimension_semantics=("parallel",),
            vmem_limit_bytes=vmem_limit,
        ),
        cost_estimate=cost,
    )(s2, si2, *weights)

    return out[:, :n_out].reshape(lead_shape + (n_torsion_angles, 2))


def init_params(key, c_s, c, n_torsion_angles):
    """Deterministic init mimicking torch.nn.Linear (uniform +/- 1/sqrt(fan_in)).

    Weights are stored as (in_features, out_features)."""
    n_out = 2 * n_torsion_angles

    def linear(key, fan_in, fan_out):
        kw, kb = jax.random.split(key)
        bound = 1.0 / jnp.sqrt(fan_in)
        w = jax.random.uniform(kw, (fan_in, fan_out), jnp.float32, -bound, bound)
        b = jax.random.uniform(kb, (1, fan_out), jnp.float32, -bound, bound)
        return w, b

    keys = jax.random.split(key, 7)
    params = {}
    params["w_in"], params["b_in"] = linear(keys[0], c_s, c)
    params["w_init"], params["b_init"] = linear(keys[1], c_s, c)
    params["w1_0"], params["b1_0"] = linear(keys[2], c, c)
    params["w2_0"], params["b2_0"] = linear(keys[3], c, c)
    params["w1_1"], params["b1_1"] = linear(keys[4], c, c)
    params["w2_1"], params["b2_1"] = linear(keys[5], c, c)
    params["w_out"], params["b_out"] = linear(keys[6], c, n_out)
    return params


def angle_resnet_ref(s, s_initial, params, n_torsion_angles=7,
                     compute_dtype=jnp.float32):
    """Pure-JAX reference (mirrors the kernel's mixed-precision dots)."""
    relu = lambda v: jnp.maximum(v, 0.0)

    def mm(v, w):
        return jnp.dot(v.astype(compute_dtype), w.astype(compute_dtype),
                       preferred_element_type=jnp.float32)

    a = (mm(relu(s), params["w_in"]) + params["b_in"]
         + mm(relu(s_initial), params["w_init"]) + params["b_init"])
    for i in range(2):
        h = mm(relu(a), params[f"w1_{i}"]) + params[f"b1_{i}"]
        h = mm(relu(h), params[f"w2_{i}"]) + params[f"b2_{i}"]
        a = a + h
    alpha = mm(relu(a), params["w_out"]) + params["b_out"]
    return alpha.reshape(alpha.shape[:-1] + (n_torsion_angles, 2))


if __name__ == "__main__":
    c_s, c = 32, 64
    n_torsion_angles = 7

    key = jax.random.PRNGKey(0)
    k_s, k_si, k_p = jax.random.split(key, 3)
    params = init_params(k_p, c_s, c, n_torsion_angles)

    # (2, 8): rows divide the tile evenly; (2, 9): exercises the ragged last block.
    for batch, n_res in ((2, 8), (2, 9)):
        s = jax.random.normal(jax.random.fold_in(k_s, n_res),
                              (batch, n_res, c_s), jnp.float32)
        s_initial = jax.random.normal(jax.random.fold_in(k_si, n_res),
                                      (batch, n_res, c_s), jnp.float32)

        out = angle_resnet_pallas(s, s_initial, params,
                                  n_torsion_angles=n_torsion_angles,
                                  tm=1024, compute_dtype=jnp.bfloat16)
        out = jax.block_until_ready(out)

        ref = angle_resnet_ref(s, s_initial, params, n_torsion_angles,
                               compute_dtype=jnp.bfloat16)
        assert out.shape == (batch, n_res, n_torsion_angles, 2), out.shape
        err = float(jnp.max(jnp.abs(out - ref)))
        assert jnp.allclose(out, ref, atol=1e-2, rtol=1e-2), (
            "mismatch vs reference", err)

    print("KERNEL_OK")
</pallas_src>

<mosaic_0001>
module attributes {stable_mosaic.version = 11 : i64} {
  func.func @angle_resnet_kernel(%arg0: i32, %arg1: memref<8x32xf32, #tpu.memory_space<vmem>>, %arg2: memref<8x32xf32, #tpu.memory_space<vmem>>, %arg3: memref<32x64xbf16, #tpu.memory_space<vmem>>, %arg4: memref<32x64xbf16, #tpu.memory_space<vmem>>, %arg5: memref<1x64xf32, #tpu.memory_space<vmem>>, %arg6: memref<64x64xbf16, #tpu.memory_space<vmem>>, %arg7: memref<1x64xf32, #tpu.memory_space<vmem>>, %arg8: memref<64x64xbf16, #tpu.memory_space<vmem>>, %arg9: memref<1x64xf32, #tpu.memory_space<vmem>>, %arg10: memref<64x64xbf16, #tpu.memory_space<vmem>>, %arg11: memref<1x64xf32, #tpu.memory_space<vmem>>, %arg12: memref<64x64xbf16, #tpu.memory_space<vmem>>, %arg13: memref<1x64xf32, #tpu.memory_space<vmem>>, %arg14: memref<64x16xbf16, #tpu.memory_space<vmem>>, %arg15: memref<1x16xf32, #tpu.memory_space<vmem>>, %arg16: memref<8x16xf32, #tpu.memory_space<vmem>>) attributes {dimension_semantics = [#tpu.dimension_semantics<parallel>], iteration_bounds = array<i64: 2>, scalar_prefetch = 0 : i64, scratch_operands = 0 : i64, tpu.core_type = #tpu.core_type<tc>, window_params = [{transform_indices = @transform_0, window_bounds = array<i64: 8, 32>}, {transform_indices = @transform_1, window_bounds = array<i64: 8, 32>}, {pipeline_mode = #tpu.pipeline_mode<synchronous>, transform_indices = @transform_2, window_bounds = array<i64: 32, 64>}, {pipeline_mode = #tpu.pipeline_mode<synchronous>, transform_indices = @transform_3, window_bounds = array<i64: 32, 64>}, {pipeline_mode = #tpu.pipeline_mode<synchronous>, transform_indices = @transform_4, window_bounds = array<i64: 1, 64>}, {pipeline_mode = #tpu.pipeline_mode<synchronous>, transform_indices = @transform_5, window_bounds = array<i64: 64, 64>}, {pipeline_mode = #tpu.pipeline_mode<synchronous>, transform_indices = @transform_6, window_bounds = array<i64: 1, 64>}, {pipeline_mode = #tpu.pipeline_mode<synchronous>, transform_indices = @transform_7, window_bounds = array<i64: 64, 64>}, {pipeline_mode = #tpu.pipeline_mode<synchronous>, transform_indices = @transform_8, window_bounds = array<i64: 1, 64>}, {pipeline_mode = #tpu.pipeline_mode<synchronous>, transform_indices = @transform_9, window_bounds = array<i64: 64, 64>}, {pipeline_mode = #tpu.pipeline_mode<synchronous>, transform_indices = @transform_10, window_bounds = array<i64: 1, 64>}, {pipeline_mode = #tpu.pipeline_mode<synchronous>, transform_indices = @transform_11, window_bounds = array<i64: 64, 64>}, {pipeline_mode = #tpu.pipeline_mode<synchronous>, transform_indices = @transform_12, window_bounds = array<i64: 1, 64>}, {pipeline_mode = #tpu.pipeline_mode<synchronous>, transform_indices = @transform_13, window_bounds = array<i64: 64, 16>}, {pipeline_mode = #tpu.pipeline_mode<synchronous>, transform_indices = @transform_14, window_bounds = array<i64: 1, 16>}, {transform_indices = @transform_15, window_bounds = array<i64: 8, 16>}]} {
    %c0 = arith.constant 0 : index
    %c0_0 = arith.constant 0 : index
    %0 = vector.load %arg1[%c0, %c0_0] : memref<8x32xf32, #tpu.memory_space<vmem>>, vector<8x32xf32>
    %cst = arith.constant 0.000000e+00 : f32
    %1 = vector.broadcast %cst : f32 to vector<8x32xf32>
    %2 = arith.maximumf %0, %1 : vector<8x32xf32>
    %3 = arith.truncf %2 : vector<8x32xf32> to vector<8x32xbf16>
    %c0_1 = arith.constant 0 : index
    %c0_2 = arith.constant 0 : index
    %4 = vector.load %arg2[%c0_1, %c0_2] : memref<8x32xf32, #tpu.memory_space<vmem>>, vector<8x32xf32>
    %cst_3 = arith.constant 0.000000e+00 : f32
    %5 = vector.broadcast %cst_3 : f32 to vector<8x32xf32>
    %6 = arith.maximumf %4, %5 : vector<8x32xf32>
    %7 = arith.truncf %6 : vector<8x32xf32> to vector<8x32xbf16>
    %c0_4 = arith.constant 0 : index
    %c0_5 = arith.constant 0 : index
    %8 = vector.load %arg3[%c0_4, %c0_5] : memref<32x64xbf16, #tpu.memory_space<vmem>>, vector<32x64xbf16>
    %cst_6 = arith.constant dense<0.000000e+00> : vector<8x64xf32>
    %9 = tpu.matmul %3, %8, %cst_6 {dimension_numbers = #tpu.dot_dimension_numbers<[1], [0], [0], [1], [0, 0, 1, 1], [], []>} : vector<8x32xbf16>, vector<32x64xbf16>, vector<8x64xf32> -> vector<8x64xf32>
    %c0_7 = arith.constant 0 : index
    %c0_8 = arith.constant 0 : index
    %10 = vector.load %arg4[%c0_7, %c0_8] : memref<32x64xbf16, #tpu.memory_space<vmem>>, vector<32x64xbf16>
    %cst_9 = arith.constant dense<0.000000e+00> : vector<8x64xf32>
    %11 = tpu.matmul %7, %10, %cst_9 {dimension_numbers = #tpu.dot_dimension_numbers<[1], [0], [0], [1], [0, 0, 1, 1], [], []>} : vector<8x32xbf16>, vector<32x64xbf16>, vector<8x64xf32> -> vector<8x64xf32>
    %12 = arith.addf %9, %11 : vector<8x64xf32>
    %c0_10 = arith.constant 0 : index
    %c0_11 = arith.constant 0 : index
    %13 = vector.load %arg5[%c0_10, %c0_11] : memref<1x64xf32, #tpu.memory_space<vmem>>, vector<1x64xf32>
    %14 = vector.broadcast %13 : vector<1x64xf32> to vector<8x64xf32>
    %15 = arith.addf %12, %14 : vector<8x64xf32>
    %cst_12 = arith.constant 0.000000e+00 : f32
    %16 = vector.broadcast %cst_12 : f32 to vector<8x64xf32>
    %17 = arith.maximumf %15, %16 : vector<8x64xf32>
    %18 = arith.truncf %17 : vector<8x64xf32> to vector<8x64xbf16>
    %c0_13 = arith.constant 0 : index
    %c0_14 = arith.constant 0 : index
    %19 = vector.load %arg6[%c0_13, %c0_14] : memref<64x64xbf16, #tpu.memory_space<vmem>>, vector<64x64xbf16>
    %cst_15 = arith.constant dense<0.000000e+00> : vector<8x64xf32>
    %20 = tpu.matmul %18, %19, %cst_15 {dimension_numbers = #tpu.dot_dimension_numbers<[1], [0], [0], [1], [0, 0, 1, 1], [], []>} : vector<8x64xbf16>, vector<64x64xbf16>, vector<8x64xf32> -> vector<8x64xf32>
    %c0_16 = arith.constant 0 : index
    %c0_17 = arith.constant 0 : index
    %21 = vector.load %arg7[%c0_16, %c0_17] : memref<1x64xf32, #tpu.memory_space<vmem>>, vector<1x64xf32>
    %22 = vector.broadcast %21 : vector<1x64xf32> to vector<8x64xf32>
    %23 = arith.addf %20, %22 : vector<8x64xf32>
    %cst_18 = arith.constant 0.000000e+00 : f32
    %24 = vector.broadcast %cst_18 : f32 to vector<8x64xf32>
    %25 = arith.maximumf %23, %24 : vector<8x64xf32>
    %26 = arith.truncf %25 : vector<8x64xf32> to vector<8x64xbf16>
    %c0_19 = arith.constant 0 : index
    %c0_20 = arith.constant 0 : index
    %27 = vector.load %arg8[%c0_19, %c0_20] : memref<64x64xbf16, #tpu.memory_space<vmem>>, vector<64x64xbf16>
    %cst_21 = arith.constant dense<0.000000e+00> : vector<8x64xf32>
    %28 = tpu.matmul %26, %27, %cst_21 {dimension_numbers = #tpu.dot_dimension_numbers<[1], [0], [0], [1], [0, 0, 1, 1], [], []>} : vector<8x64xbf16>, vector<64x64xbf16>, vector<8x64xf32> -> vector<8x64xf32>
    %c0_22 = arith.constant 0 : index
    %c0_23 = arith.constant 0 : index
    %29 = vector.load %arg9[%c0_22, %c0_23] : memref<1x64xf32, #tpu.memory_space<vmem>>, vector<1x64xf32>
    %30 = vector.broadcast %29 : vector<1x64xf32> to vector<8x64xf32>
    %31 = arith.addf %28, %30 : vector<8x64xf32>
    %32 = arith.addf %15, %31 : vector<8x64xf32>
    %cst_24 = arith.constant 0.000000e+00 : f32
    %33 = vector.broadcast %cst_24 : f32 to vector<8x64xf32>
    %34 = arith.maximumf %32, %33 : vector<8x64xf32>
    %35 = arith.truncf %34 : vector<8x64xf32> to vector<8x64xbf16>
    %c0_25 = arith.constant 0 : index
    %c0_26 = arith.constant 0 : index
    %36 = vector.load %arg10[%c0_25, %c0_26] : memref<64x64xbf16, #tpu.memory_space<vmem>>, vector<64x64xbf16>
    %cst_27 = arith.constant dense<0.000000e+00> : vector<8x64xf32>
    %37 = tpu.matmul %35, %36, %cst_27 {dimension_numbers = #tpu.dot_dimension_numbers<[1], [0], [0], [1], [0, 0, 1, 1], [], []>} : vector<8x64xbf16>, vector<64x64xbf16>, vector<8x64xf32> -> vector<8x64xf32>
    %c0_28 = arith.constant 0 : index
    %c0_29 = arith.constant 0 : index
    %38 = vector.load %arg11[%c0_28, %c0_29] : memref<1x64xf32, #tpu.memory_space<vmem>>, vector<1x64xf32>
    %39 = vector.broadcast %38 : vector<1x64xf32> to vector<8x64xf32>
    %40 = arith.addf %37, %39 : vector<8x64xf32>
    %cst_30 = arith.constant 0.000000e+00 : f32
    %41 = vector.broadcast %cst_30 : f32 to vector<8x64xf32>
    %42 = arith.maximumf %40, %41 : vector<8x64xf32>
    %43 = arith.truncf %42 : vector<8x64xf32> to vector<8x64xbf16>
    %c0_31 = arith.constant 0 : index
    %c0_32 = arith.constant 0 : index
    %44 = vector.load %arg12[%c0_31, %c0_32] : memref<64x64xbf16, #tpu.memory_space<vmem>>, vector<64x64xbf16>
    %cst_33 = arith.constant dense<0.000000e+00> : vector<8x64xf32>
    %45 = tpu.matmul %43, %44, %cst_33 {dimension_numbers = #tpu.dot_dimension_numbers<[1], [0], [0], [1], [0, 0, 1, 1], [], []>} : vector<8x64xbf16>, vector<64x64xbf16>, vector<8x64xf32> -> vector<8x64xf32>
    %c0_34 = arith.constant 0 : index
    %c0_35 = arith.constant 0 : index
    %46 = vector.load %arg13[%c0_34, %c0_35] : memref<1x64xf32, #tpu.memory_space<vmem>>, vector<1x64xf32>
    %47 = vector.broadcast %46 : vector<1x64xf32> to vector<8x64xf32>
    %48 = arith.addf %45, %47 : vector<8x64xf32>
    %49 = arith.addf %32, %48 : vector<8x64xf32>
    %cst_36 = arith.constant 0.000000e+00 : f32
    %50 = vector.broadcast %cst_36 : f32 to vector<8x64xf32>
    %51 = arith.maximumf %49, %50 : vector<8x64xf32>
    %52 = arith.truncf %51 : vector<8x64xf32> to vector<8x64xbf16>
    %c0_37 = arith.constant 0 : index
    %c0_38 = arith.constant 0 : index
    %53 = vector.load %arg14[%c0_37, %c0_38] : memref<64x16xbf16, #tpu.memory_space<vmem>>, vector<64x16xbf16>
    %cst_39 = arith.constant dense<0.000000e+00> : vector<8x16xf32>
    %54 = tpu.matmul %52, %53, %cst_39 {dimension_numbers = #tpu.dot_dimension_numbers<[1], [0], [0], [1], [0, 0, 1, 1], [], []>} : vector<8x64xbf16>, vector<64x16xbf16>, vector<8x16xf32> -> vector<8x16xf32>
    %c0_40 = arith.constant 0 : index
    %c0_41 = arith.constant 0 : index
    %55 = vector.load %arg15[%c0_40, %c0_41] : memref<1x16xf32, #tpu.memory_space<vmem>>, vector<1x16xf32>
    %56 = vector.broadcast %55 : vector<1x16xf32> to vector<8x16xf32>
    %57 = arith.addf %54, %56 : vector<8x16xf32>
    %c0_42 = arith.constant 0 : index
    %c0_43 = arith.constant 0 : index
    %58 = vector.load %arg16[%c0_42, %c0_43] : memref<8x16xf32, #tpu.memory_space<vmem>>, vector<8x16xf32>
    tpu.vector_store %arg16[%c0_42, %c0_43], %57 {strides = array<i32>} : memref<8x16xf32, #tpu.memory_space<vmem>>, vector<8x16xf32>,
    return
  }
  func.func @transform_0(%arg0: i32) -> (i32, i32) {
    %c0_i32 = arith.constant 0 : i32
    %c0_i32_0 = arith.constant 0 : i32
    return %arg0, %c0_i32 : i32, i32
  }
  func.func @transform_1(%arg0: i32) -> (i32, i32) {
    %c0_i32 = arith.constant 0 : i32
    %c0_i32_0 = arith.constant 0 : i32
    return %arg0, %c0_i32 : i32, i32
  }
  func.func @transform_2(%arg0: i32) -> (i32, i32) {
    %c0_i32 = arith.constant 0 : i32
    %c0_i32_0 = arith.constant 0 : i32
    %c0_i32_1 = arith.constant 0 : i32
    return %c0_i32, %c0_i32_0 : i32, i32
  }
  func.func @transform_3(%arg0: i32) -> (i32, i32) {
    %c0_i32 = arith.constant 0 : i32
    %c0_i32_0 = arith.constant 0 : i32
    %c0_i32_1 = arith.constant 0 : i32
    return %c0_i32, %c0_i32_0 : i32, i32
  }
  func.func @transform_4(%arg0: i32) -> (i32, i32) {
    %c0_i32 = arith.constant 0 : i32
    %c0_i32_0 = arith.constant 0 : i32
    %c0_i32_1 = arith.constant 0 : i32
    return %c0_i32, %c0_i32_0 : i32, i32
  }
  func.func @transform_5(%arg0: i32) -> (i32, i32) {
    %c0_i32 = arith.constant 0 : i32
    %c0_i32_0 = arith.constant 0 : i32
    %c0_i32_1 = arith.constant 0 : i32
    return %c0_i32, %c0_i32_0 : i32, i32
  }
  func.func @transform_6(%arg0: i32) -> (i32, i32) {
    %c0_i32 = arith.constant 0 : i32
    %c0_i32_0 = arith.constant 0 : i32
    %c0_i32_1 = arith.constant 0 : i32
    return %c0_i32, %c0_i32_0 : i32, i32
  }
  func.func @transform_7(%arg0: i32) -> (i32, i32) {
    %c0_i32 = arith.constant 0 : i32
    %c0_i32_0 = arith.constant 0 : i32
    %c0_i32_1 = arith.constant 0 : i32
    return %c0_i32, %c0_i32_0 : i32, i32
  }
  func.func @transform_8(%arg0: i32) -> (i32, i32) {
    %c0_i32 = arith.constant 0 : i32
    %c0_i32_0 = arith.constant 0 : i32
    %c0_i32_1 = arith.constant 0 : i32
    return %c0_i32, %c0_i32_0 : i32, i32
  }
  func.func @transform_9(%arg0: i32) -> (i32, i32) {
    %c0_i32 = arith.constant 0 : i32
    %c0_i32_0 = arith.constant 0 : i32
    %c0_i32_1 = arith.constant 0 : i32
    return %c0_i32, %c0_i32_0 : i32, i32
  }
  func.func @transform_10(%arg0: i32) -> (i32, i32) {
    %c0_i32 = arith.constant 0 : i32
    %c0_i32_0 = arith.constant 0 : i32
    %c0_i32_1 = arith.constant 0 : i32
    return %c0_i32, %c0_i32_0 : i32, i32
  }
  func.func @transform_11(%arg0: i32) -> (i32, i32) {
    %c0_i32 = arith.constant 0 : i32
    %c0_i32_0 = arith.constant 0 : i32
    %c0_i32_1 = arith.constant 0 : i32
    return %c0_i32, %c0_i32_0 : i32, i32
  }
  func.func @transform_12(%arg0: i32) -> (i32, i32) {
    %c0_i32 = arith.constant 0 : i32
    %c0_i32_0 = arith.constant 0 : i32
    %c0_i32_1 = arith.constant 0 : i32
    return %c0_i32, %c0_i32_0 : i32, i32
  }
  func.func @transform_13(%arg0: i32) -> (i32, i32) {
    %c0_i32 = arith.constant 0 : i32
    %c0_i32_0 = arith.constant 0 : i32
    %c0_i32_1 = arith.constant 0 : i32
    return %c0_i32, %c0_i32_0 : i32, i32
  }
  func.func @transform_14(%arg0: i32) -> (i32, i32) {
    %c0_i32 = arith.constant 0 : i32
    %c0_i32_0 = arith.constant 0 : i32
    %c0_i32_1 = arith.constant 0 : i32
    return %c0_i32, %c0_i32_0 : i32, i32
  }
  func.func @transform_15(%arg0: i32) -> (i32, i32) {
    %c0_i32 = arith.constant 0 : i32
    %c0_i32_0 = arith.constant 0 : i32
    return %arg0, %c0_i32 : i32, i32
  }
}

</mosaic_0001>

<bundles_post_ra>
// kernel: tpu_custom_call.1
= control target key start
LH: loop header
LB: loop body
LE: loop exit
PB: predicated region body
PF: predicated region fallthrough
CT: control target
= control target key end

     0   :  { %s2446_s0 = inlined_call_operand.hbm [shape: f32[16,32], index: 0, kind: input, shape index: {}]   ;;  %s2447_s1 = inlined_call_operand.hbm [shape: f32[16,32], index: 1, kind: input, shape index: {}]   ;;  %s2448_s2 = inlined_call_operand.hbm [shape: bf16[32,64], index: 2, kind: input, shape index: {}]   ;;  %s2449_s3 = inlined_call_operand.hbm [shape: bf16[32,64], index: 3, kind: input, shape index: {}]   ;;  %s2450_s4 = inlined_call_operand.vmem [shape: f32[1,64], index: 4, kind: input, shape index: {}]   ;;  %s2451_s5 = inlined_call_operand.vmem [shape: bf16[64,64], index: 5, kind: input, shape index: {}]   ;;  %s2452_s6 = inlined_call_operand.vmem [shape: f32[1,64], index: 6, kind: input, shape index: {}]   ;;  %s2453_s7 = inlined_call_operand.vmem [shape: bf16[64,64], index: 7, kind: input, shape index: {}]   ;;  %s2454_s8 = inlined_call_operand.hbm [shape: f32[1,64], index: 8, kind: input, shape index: {}]   ;;  %s2455_s9 = inlined_call_operand.hbm [shape: bf16[64,64], index: 9, kind: input, shape index: {}]   ;;  %s2456_s10 = inlined_call_operand.vmem [shape: f32[1,64], index: 10, kind: input, shape index: {}]   ;;  %s2457_s11 = inlined_call_operand.hbm [shape: bf16[64,64], index: 11, kind: input, shape index: {}]   ;;  %s2458_s12 = inlined_call_operand.vmem [shape: f32[1,64], index: 12, kind: input, shape index: {}]   ;;  %s2459_s13 = inlined_call_operand.vmem [shape: bf16[64,16], index: 13, kind: input, shape index: {}]   ;;  %s2460_s14 = inlined_call_operand.vmem [shape: f32[1,16], index: 14, kind: input, shape index: {}]   ;;  %s2461_s15 = inlined_call_operand.hbm [shape: f32[16,16], index: 15, kind: output, shape index: {}]  }
   0x1   :  { %2468 = sst [smem:[#allocation21_spill]] %s2448_s2 }
   0x2   :  { %2469 = sst [smem:[#allocation22_spill]] %s2449_s3 }
   0x3   :  { %2470 = sst [smem:[#allocation23_spill]] %s2450_s4 }
   0x4   :  { %2471 = sst [smem:[#allocation24_spill]] %s2452_s6 }
   0x5   :  { %2472 = sst [smem:[#allocation25_spill]] %s2454_s8 }
   0x6   :  { %2473 = sst [smem:[#allocation26_spill]] %s2455_s9 }
   0x7   :  { %2474 = sst [smem:[#allocation27_spill]] %s2456_s10 }
   0x8   :  { %2475 = sst [smem:[#allocation28_spill]] %s2457_s11 }
   0x9   :  { %2476 = sst [smem:[#allocation29_spill]] %s2458_s12 }
   0xa   :  { %2477 = sst [smem:[#allocation30_spill]] %s2459_s13 }
   0xb   :  { %2478 = sst [smem:[#allocation31_spill]] %s2460_s14 }
   0xc   :  { %2479 = sst [smem:[#allocation32_spill]] %s2461_s15 }
   0xd   :  { %20 = vsyncpa [#allocation3], 0 }
   0xe   :  { %22 = vsyncpa [#allocation3 + $0x1], 0 }
   0xf   :  { %23 = vsyncpa [#allocation6], 0 }
  0x10   :  { %25 = vsyncpa [#allocation6 + $0x1], 0 }
  0x11   :  { %26 = vsyncpa [#allocation9], 0 }
  0x12   :  { %27 = vsyncpa [#allocation12], 0 }
  0x13   :  { %28 = vsyncpa [#allocation4], 0 }
  0x14   :  { %30 = vsyncpa [#allocation4 + $0x1], 0  ;;  %s2005_s18 = smov 0   ;;  %s2007_s19 = smov 0  }
  0x15   :  { %s2009_s20 = smov 0   ;;  %s2011_s21 = smov 0  }
  0x16 LB: > { %s1913_s22 = smov [#allocation7]   ;;  %s2026_s24 = sadd.s32 4294967295, %s1911_s21   ;;  %s1911_s21 = sphi %s2011_s21, %s2514_s21   ;;  %s1907_s20 = sphi %s2009_s20, %s2513_s20   ;;  %s1903_s19 = sphi %s2007_s19, %s2512_s19   ;;  %s1899_s18 = sphi %s2005_s18, %s2511_s18  }
  0x17   : > { %s404_s23 = sshll.u32 %s1913_s22, 4  ;;  %p1331_p0 = scmp.ge.s32.totalorder %s1911_s21, 1  ;;  %s2031_s23 = int_to_ptr.vmem [resolvable:$true] %s404_s23 }
  0x18   : > { %p2464_p1 = scmp.eq.s32.totalorder %s2026_s24, 0  ;;  %p392_p2 = scmp.lt.s32.totalorder %s1911_s21, 3 }
  0x19   : > { %s1914_s26 = smov [#allocation8]   ;;  %s1915_s29 = smov [#allocation11]  }
  0x1a   : > { %p2033_p3 = pnand %p1331_p0, %p392_p2  ;;  %s417_s27 = sshll.u32 %s1914_s26, 4  ;;  %s2046_s27 = int_to_ptr.vmem [resolvable:$true] %s417_s27 }
  0x1b   : > { %s453_s30 = sshll.u32 %s1915_s29, 4  ;;  %s2482_s2 = sld [smem:[#allocation21_spill]]  ;;  %s2048_s30 = int_to_ptr.vmem [resolvable:$true] %s453_s30 }
  0x1c   : > { %s2480_s25 = scalar_select %p2033_p3, 1, 0 }
  0x1d   : > { %p1525_p5 = pneg %p2033_p3 }
  0x1f   : > { %p2042_p6 = pnand %p1525_p5, %p2464_p1 }
  0x21   : > { %s1629_s22 = scalar_lea.hbm %s2482_s2, 256  ;;  %p2058_p8 = pneg %p2042_p6 }
  0x22   : > { %p1630_p7 = scmp.ne.s32.totalorder %s2482_s2, %s1629_s22  ;;  %p1636_p11 = scmp.lt.u32.totalorder %s1629_s22, %s2482_s2 }
  0x24   : > { %p1632_p9 = pnand %p2058_p8, %p1630_p7 }
  0x26   : > { %p1633_p10 = pneg %p1632_p9 }
  0x28   : > { %p1638_p12 = pnand %p1636_p11, %p1633_p10 }
  0x2a   : > { %1641 = shalt.err (!%p1638_p12)
}
  0x2b   : > { %s1642_s14 = scalar_lea.vmem %s2031_s23, 256  ;;  %p1650_p5 = scmp.lt.s32.totalorder %s2031_s23, %s2031_s23 }
  0x2c   : > { %p1643_p13 = scmp.ne.s32.totalorder %s2031_s23, %s1642_s14  ;;  %p1651_p4 = scmp.lt.s32.totalorder %s1642_s14, %s1642_s14 }
  0x2e   : > { %p1645_p0 = pnand %p1643_p13, %p2058_p8  ;;  %p1652_p7 = por %p1651_p4, %p1650_p5 }
  0x30   : > { %p1646_p2 = pneg %p1645_p0 }
  0x32   : > { %p1653_p9 = pnand %p1652_p7, %p1646_p2 }
  0x34   : > { %1656 = shalt.err (!%p1653_p9)
}
  0x35   : > { %s1916_s15 = smov 64   ;;  %s1917_s12 = smov 4  }
  0x36   : > { %1528 = dma.hbm_to_vmem [thread:$0]  (!%p2042_p6), %s2482_s2, 256, %s2031_s23, [#allocation6], %s1916_s15, %s1916_s15, %s1917_s12  }
  0x37   : > { %s2484_s3 = sld [smem:[#allocation22_spill]] }
  0x3d   : > { %s1657_s14 = scalar_lea.hbm %s2484_s3, 256 }
  0x3e   : > { %p1658_p4 = scmp.ne.s32.totalorder %s2484_s3, %s1657_s14  ;;  %p1664_p12 = scmp.lt.u32.totalorder %s1657_s14, %s2484_s3 }
  0x40   : > { %p1660_p10 = pnand %p1658_p4, %p2058_p8 }
  0x42   : > { %p1661_p11 = pneg %p1660_p10 }
  0x44   : > { %p1666_p13 = pnand %p1664_p12, %p1661_p11 }
  0x46   : > { %1669 = shalt.err (!%p1666_p13)
}
  0x47   : > { %s1670_s23 = scalar_lea.vmem %s2046_s27, 256  ;;  %p1678_p7 = scmp.lt.s32.totalorder %s2046_s27, %s2046_s27 }
  0x48   : > { %p1671_p0 = scmp.ne.s32.totalorder %s2046_s27, %s1670_s23  ;;  %p1679_p9 = scmp.lt.s32.totalorder %s1670_s23, %s1670_s23 }
  0x4a   : > { %p1673_p2 = pnand %p1671_p0, %p2058_p8  ;;  %p1680_p4 = por %p1679_p9, %p1678_p7 }
  0x4c   : > { %p1674_p5 = pneg %p1673_p2 }
  0x4e   : > { %p1681_p10 = pnand %p1680_p4, %p1674_p5 }
  0x50   : > { %1684 = shalt.err (!%p1681_p10)
}
  0x51   : > { %1531 = dma.hbm_to_vmem [thread:$0]  (!%p2042_p6), %s2484_s3, 256, %s2046_s27, [#allocation9], %s1916_s15, %s1916_s15, %s1917_s12  }
  0x52   : > { %s2485_s9 = sld [smem:[#allocation26_spill]] }
  0x58   : > { %s1685_s16 = scalar_lea.hbm %s2485_s9, 512 }
  0x59   : > { %p1686_p11 = scmp.ne.s32.totalorder %s2485_s9, %s1685_s16  ;;  %p1692_p0 = scmp.lt.u32.totalorder %s1685_s16, %s2485_s9 }
  0x5b   : > { %p1688_p12 = pnand %p1686_p11, %p2058_p8 }
  0x5d   : > { %p1689_p13 = pneg %p1688_p12 }
  0x5f   : > { %p1694_p2 = pnand %p1692_p0, %p1689_p13 }
  0x61   : > { %1697 = shalt.err (!%p1694_p2)
}
  0x62   : > { %s1698_s27 = scalar_lea.vmem %s2048_s30, 512  ;;  %p1706_p4 = scmp.lt.s32.totalorder %s2048_s30, %s2048_s30 }
  0x63   : > { %p1699_p5 = scmp.ne.s32.totalorder %s2048_s30, %s1698_s27  ;;  %p1707_p10 = scmp.lt.s32.totalorder %s1698_s27, %s1698_s27 }
  0x65   : > { %p1701_p7 = pnand %p1699_p5, %p2058_p8  ;;  %p1708_p11 = por %p1707_p10, %p1706_p4 }
  0x67   : > { %p1702_p9 = pneg %p1701_p7 }
  0x69   : > { %p1709_p12 = pnand %p1708_p11, %p1702_p9 }
  0x6b   : > { %1712 = shalt.err (!%p1709_p12)
}
  0x6c   : > { %1537 = dma.hbm_to_vmem [thread:$0]  (!%p2042_p6), %s2485_s9, 512, %s2048_s30, [#allocation12], %s1916_s15, %s1916_s15, %s1917_s12  }
  0x6d   : > { %s1918_s6 = smov [#allocation10]   ;;  %s1919_s13 = smov [#allocation13]  }
  0x6e   : > { %s443_s10 = sshll.u32 %s1918_s6, 4  ;;  %s469_s16 = sshll.u32 %s1919_s13, 4  ;;  %s444_s10 = int_to_ptr.vmem [resolvable:$true] %s443_s10  ;;  %s470_s16 = int_to_ptr.vmem [resolvable:$true] %s469_s16 }
  0x6f   : > { %s2486_s8 = sld [smem:[#allocation25_spill]] }
  0x75   : > { %s1713_s29 = scalar_lea.hbm %s2486_s8, 16 }
  0x76   : > { %p1714_p13 = scmp.ne.s32.totalorder %s2486_s8, %s1713_s29  ;;  %p1720_p5 = scmp.lt.u32.totalorder %s1713_s29, %s2486_s8 }
  0x78   : > { %p1716_p0 = pnand %p1714_p13, %p2058_p8 }
  0x7a   : > { %p1717_p2 = pneg %p1716_p0 }
  0x7c   : > { %p1722_p7 = pnand %p1720_p5, %p1717_p2 }
  0x7e   : > { %1725 = shalt.err (!%p1722_p7)
}
  0x7f   : > { %s1726_s30 = scalar_lea.vmem %s444_s10, 16  ;;  %s1733_s4 = scalar_lea.vmem %s444_s10, 32 }
  0x80   : > { %p1727_p9 = scmp.ne.s32.totalorder %s444_s10, %s1726_s30  ;;  %p1734_p11 = scmp.lt.s32.totalorder %s444_s10, %s444_s10 }
  0x81   : > { %p1735_p12 = scmp.lt.s32.totalorder %s1733_s4, %s1726_s30 }
  0x82   : > { %p1729_p4 = pnand %p1727_p9, %p2058_p8 }
  0x83   : > { %p1736_p1 = por %p1735_p12, %p1734_p11 }
  0x84   : > { %p1730_p10 = pneg %p1729_p4 }
  0x86   : > { %p1737_p3 = pnand %p1736_p1, %p1730_p10 }
  0x88   : > { %1740 = shalt.err (!%p1737_p3)
}
  0x89   : > { %1534 = dma.hbm_to_vmem [thread:$0]  (!%p2042_p6), %s2486_s8, 16, %s444_s10, [#allocation9]  }
  0x8a   : > { %s2487_s11 = sld [smem:[#allocation28_spill]] }
  0x90   : > { %s1741_s22 = scalar_lea.hbm %s2487_s11, 512 }
  0x91   : > { %p1742_p13 = scmp.ne.s32.totalorder %s2487_s11, %s1741_s22  ;;  %p1748_p3 = scmp.lt.u32.totalorder %s1741_s22, %s2487_s11 }
  0x93   : > { %p1744_p0 = pnand %p1742_p13, %p2058_p8 }
  0x95   : > { %p1745_p1 = pneg %p1744_p0 }
  0x97   : > { %p1750_p2 = pnand %p1748_p3, %p1745_p1 }
  0x99   : > { %1753 = shalt.err (!%p1750_p2)
}
  0x9a   : > { %s1754_s30 = scalar_lea.vmem %s470_s16, 512  ;;  %p1762_p4 = scmp.lt.s32.totalorder %s470_s16, %s470_s16 }
  0x9b   : > { %p1755_p5 = scmp.ne.s32.totalorder %s470_s16, %s1754_s30  ;;  %p1763_p10 = scmp.lt.s32.totalorder %s1754_s30, %s1754_s30 }
  0x9d   : > { %p1757_p7 = pnand %p1755_p5, %p2058_p8  ;;  %p1764_p11 = por %p1763_p10, %p1762_p4 }
  0x9f   : > { %p1758_p9 = pneg %p1757_p7 }
  0xa1   : > { %p1765_p12 = pnand %p1764_p11, %p1758_p9 }
  0xa3   : > { %1768 = shalt.err (!%p1765_p12)
}
  0xa4   : > { %1540 = dma.hbm_to_vmem [thread:$0]  (!%p2042_p6), %s2487_s11, 512, %s470_s16, [#allocation12], %s1916_s15, %s1916_s15, %s1917_s12  }
  0xa5   : > { %s1330_s28 = sadd.s32 4294967294, %s1911_s21   ;;  %s2175_s26 = sadd.s32 1, %s1911_s21  }
  0xa6   : > { %s43_s6 = sadd.s32 1, %s1907_s20  ;;  %s40_s13 = ssub.s32 %s1911_s21, %s2175_s26 }
  0xa7   : > { %p50_p8 = scmp.ne.s32.totalorder %s1907_s20, %s1903_s19  ;;  %p41_p13 = scmp.eq.s32.totalorder %s40_s13, 0 }
  0xa8   : > { %p51_p0 = scmp.eq.s32.totalorder %s1911_s21, 0  ;;  %p56_p1 = scmp.ne.s32.totalorder %s1903_s19, %s1899_s18 }
  0xa9   : > { %p379_p3 = scmp.eq.s32.totalorder %s2026_s24, 1  ;;  %p2488_p5 = scmp.eq.s32.totalorder %s2026_s24, 0 }
  0xaa   : > { %s2187_s2 = scalar_select %p41_p13, %s1907_s20, %s43_s6  }
  0xab   : > { %p52_p2 = por %p51_p0, %p50_p8  ;;  %p2191_p7 = por %p2488_p5, %p56_p1 }
  0xac   : > { %p2195_p6 = por %p379_p3, %p50_p8  ;;  %p385_p9 = scmp.eq.s32.totalorder %s1330_s28, 1 }
  0xad   : > { %s2489_s17 = scalar_select %p2191_p7, 1, 0 }
  0xae   : > { %s2490_s15 = scalar_select %p2195_p6, 1, 0 }
  0xaf   : > { %p1557_p4 = scmp.lt.s32.totalorder %s1911_s21, 2  ;;  %s492_s12 = sand.u32 1, %s1907_s20  }
  0xb0   : > { %p2201_p10 = por %p385_p9, %p56_p1  ;;  %s2205_s22 = sshll.u32 %s492_s12, 3 }
  0xb1   : > { %s1339_s29 = sshll.u32 %s1911_s21, 7  ;;  %s496_s30 = scalar_lea.vmem [#allocation2], %s2205_s22 }
  0xb2   : > { %s2491_s16 = scalar_select %p2201_p10, 1, 0 }
  0xb3   : > { %s2211_s23 = scalar_lea.hbm %s2446_s0, %s1339_s29  ;;  %s503_s10 = sshll.u32 %s496_s30, 4  ;;  %s2218_s10 = int_to_ptr.vmem [resolvable:$true] %s503_s10 }
  0xb4   : > { %p2214_p11 = pnand %p1557_p4, %p52_p2  ;;  %s2223_s13 = scalar_lea.hbm %s2447_s1, %s1339_s29 }
  0xb5   : > { %s493_s14 = scalar_lea.sflag [#allocation3], %s492_s12  ;;  %s1769_s27 = scalar_lea.hbm %s2211_s23, 128 }
  0xb6   : > { %p1770_p12 = scmp.ne.s32.totalorder %s2211_s23, %s1769_s27  ;;  %p1771_p8 = pneg %p2214_p11 }
  0xb7   : > { %s1774_s8 = scalar_lea.hbm %s2446_s0, 256  ;;  %p1775_p1 = scmp.lt.u32.totalorder %s2211_s23, %s2446_s0 }
  0xb8   : > { %p1772_p13 = pnand %p1771_p8, %p1770_p12  ;;  %p1776_p3 = scmp.lt.u32.totalorder %s1774_s8, %s1769_s27 }
  0xb9   : > { %p1778_p5 = scmp.lt.u32.totalorder %s1769_s27, %s2211_s23 }
  0xba   : > { %p1773_p0 = pneg %p1772_p13  ;;  %p1777_p2 = por %p1776_p3, %p1775_p1 }
  0xbc   : > { %p1779_p9 = por %p1778_p5, %p1777_p2 }
  0xbe   : > { %p1780_p4 = pnand %p1779_p9, %p1773_p0 }
  0xc0   : > { %1783 = shalt.err (!%p1780_p4)
}
  0xc1   : > { %s1784_s12 = scalar_lea.vmem %s2218_s10, 128  ;;  %s1920_s3 = smov [#allocation2]  }
  0xc2   : > { %p1785_p12 = scmp.ne.s32.totalorder %s2218_s10, %s1784_s12  ;;  %s1789_s29 = sshll.u32 %s1920_s3, 4  ;;  %s1790_s29 = int_to_ptr.vmem [resolvable:$false] %s1789_s29 }
  0xc3   : > { %s1791_s9 = scalar_lea.vmem %s1790_s29, 256  ;;  %p1792_p6 = scmp.lt.s32.totalorder %s2218_s10, %s1790_s29 }
  0xc4   : > { %p1787_p13 = pnand %p1785_p12, %p1771_p8  ;;  %p1793_p1 = scmp.lt.s32.totalorder %s1791_s9, %s1784_s12 }
  0xc6   : > { %p1788_p10 = pneg %p1787_p13  ;;  %p1794_p3 = por %p1793_p1, %p1792_p6 }
  0xc8   : > { %p1795_p2 = pnand %p1794_p3, %p1788_p10 }
  0xca   : > { %1798 = shalt.err (!%p1795_p2)
}
  0xcb   : > { %1544 = dma.hbm_to_vmem [thread:$0]  (!%p2214_p11), %s2211_s23, 128, %s2218_s10, %s493_s14  }
  0xcc   : > { %s510_s8 = sand.u32 1, %s1911_s21   ;;  %s514_s11 = scalar_lea.vmem [#allocation5], %s2205_s22 }
  0xcd   : > { %s521_s28 = sshll.u32 %s514_s11, 4  ;;  %s511_s6 = scalar_lea.sflag [#allocation6], %s510_s8  ;;  %s522_s28 = int_to_ptr.vmem [resolvable:$true] %s521_s28 }
  0xce   : > { %s1799_s27 = scalar_lea.hbm %s2223_s13, 128  ;;  %s1804_s3 = scalar_lea.hbm %s2447_s1, 256 }
  0xcf   : > { %p1800_p6 = scmp.ne.s32.totalorder %s2223_s13, %s1799_s27  ;;  %p1805_p5 = scmp.lt.u32.totalorder %s2223_s13, %s2447_s1 }
  0xd0   : > { %p1806_p9 = scmp.lt.u32.totalorder %s1804_s3, %s1799_s27  ;;  %p1808_p12 = scmp.lt.u32.totalorder %s1799_s27, %s2223_s13 }
  0xd1   : > { %p1802_p10 = pnand %p1800_p6, %p1771_p8 }
  0xd2   : > { %p1807_p4 = por %p1806_p9, %p1805_p5 }
  0xd3   : > { %p1803_p0 = pneg %p1802_p10 }
  0xd4   : > { %p1809_p13 = por %p1808_p12, %p1807_p4 }
  0xd6   : > { %p1810_p1 = pnand %p1809_p13, %p1803_p0 }
  0xd8   : > { %1813 = shalt.err (!%p1810_p1)
}
  0xd9   : > { %s1814_s22 = scalar_lea.vmem %s522_s28, 128  ;;  %s1921_s23 = smov [#allocation5]  }
  0xda   : > { %p1815_p3 = scmp.ne.s32.totalorder %s522_s28, %s1814_s22  ;;  %s1819_s10 = sshll.u32 %s1921_s23, 4  ;;  %s1820_s10 = int_to_ptr.vmem [resolvable:$false] %s1819_s10 }
  0xdb   : > { %s1821_s14 = scalar_lea.vmem %s1820_s10, 256  ;;  %p1822_p10 = scmp.lt.s32.totalorder %s522_s28, %s1820_s10 }
  0xdc   : > { %p1817_p2 = pnand %p1815_p3, %p1771_p8  ;;  %p1823_p7 = scmp.lt.s32.totalorder %s1821_s14, %s1814_s22 }
  0xde   : > { %p1818_p6 = pneg %p1817_p2  ;;  %p1824_p5 = por %p1823_p7, %p1822_p10 }
  0xe0   : > { %p1825_p9 = pnand %p1824_p5, %p1818_p6 }
  0xe2   : > { %1828 = shalt.err (!%p1825_p9)
}
  0xe3   : > { %1547 = dma.hbm_to_vmem [thread:$0]  (!%p2214_p11), %s2223_s13, 128, %s522_s28, %s511_s6  }
  0xe4   : > { %p2493_p0 = scmp.ne.s32.totalorder %s2480_s25, 0 }
  0xe5   : > { %s2274_s8 = sand.u32 (!%p2493_p0), 1, %s1903_s19   ;;  %p2494_p7 = scmp.ne.s32.totalorder (!%p2493_p0), %s2489_s17, 0 }
  0xe6   : > { %530 = sbr.rel (%p2493_p0) target bundleno = 1593 (0x639), region = 80  ;;  %s2277_s11 = sshll.u32 (!%p2493_p0), %s2274_s8, 3 }
  0xe7   : > { %s533_s27 = scalar_lea.sflag (!%p2493_p0), [#allocation3], %s2274_s8  ;;  %s536_s30 = scalar_lea.vmem (!%p2493_p0), [#allocation2], %s2277_s11 }
  0xed   : > { %1874 = dma.done.wait (%p2494_p7), %s533_s27, 128  }
  0xee   : > { %1876 = vsyncadd (%p2494_p7), %s533_s27, 4294967168  ;;  %s541_s25 = sand.u32 1, %s2026_s24   ;;  %s545_s13 = scalar_lea.vmem [#allocation5], %s2277_s11 }
  0xef   : > { %s542_s4 = scalar_lea.sflag [#allocation6], %s541_s25 }
  0xf0   : > { %1878 = dma.done.wait (%p2494_p7), %s542_s4, 128  }
  0xf1   : > { %1880 = vsyncadd (%p2494_p7), %s542_s4, 4294967168  ;;  %p2495_p11 = scmp.eq.s32.totalorder %s2026_s24, 0 }
  0xf3   : > { %1882 = dma.done.wait (%p2495_p11), [#allocation6], 256   ;;  %p2496_p8 = pmov %p2495_p11 }
  0xf5   : > { %1884 = vsyncadd (%p2496_p8), [#allocation6], 4294967040  ;;  %p2497_p4 = pmov %p2496_p8 }
  0xf7   : > { %1886 = dma.done.wait (%p2497_p4), [#allocation9], 272   ;;  %p2498_p12 = pmov %p2497_p4 }
  0xf8   : > { %p2499_p13 = pmov %p2497_p4 }
  0xf9   : > { %1888 = vsyncadd (%p2498_p12), [#allocation9], 4294967024 }
  0xfa   : > { %1890 = dma.done.wait (%p2499_p13), [#allocation12], 1024   ;;  %p2500_p1 = pmov %p2497_p4 }
  0xfb   : > { %v1922_v0 = vmov 0.0   ;;  %vm1923_vm0 = vmmov 0   ;;  %v1605_v1 = vld [vmem:[#allocation8] sm:$0xff]   ;;  %v1606_v2 = vld [vmem:[#allocation8 + $0x8] sm:$0xff]   ;;  %vm644_vm1 = vcmask 261120   ;;  %v618_v5 = vld [vmem:[%s536_s30] sm:$0xff] }
  0xfc   : > { %1892 = vsyncadd (%p2500_p1), [#allocation12], 4294966272  ;;  %1423 = vmatprep.subr.bf16.mxu1 %v1922_v0  ;;  %1427 = vmatprep.mubr.msk.bf16.mxu1 %vm1923_vm0, %v1922_v0  ;;  %v621_v3 = vld [vmem:[%s545_s13] sm:$0xff]  ;;  %v1607_v7 = vld [vmem:[#allocation7] sm:$0xff]   ;;  %v619_v8 = vmax.f32 %v618_v5, 0.0  ;;  %s2501_s4 = sld [smem:[#allocation23_spill]] }
  0xfd   : > { %1439 = vmatprep.subr.bf16.mxu0 %v1922_v0  ;;  %1447 = vmatprep.mubr.msk.bf16.mxu0 %vm1923_vm0, %v1922_v0  ;;  %v622_v4 = vmax.f32 %v621_v3, 0.0  ;;  %v1608_v9 = vld [vmem:[#allocation7 + $0x8] sm:$0xff]   ;;  %v1609_v11 = vld [vmem:[%s2451_s5] sm:$0xff]   ;;  %v1611_v13 = vld [vmem:[%s2451_s5 + $0x10] sm:$0xff]   ;;  %vm792_vm2 = vcmask 523264   ;;  %s2502_s29 = sld [smem:[#allocation24_spill]] }
  0xfe   : > { %1424 = vmatpush3.bf16.msra.mxu1 %v1605_v1  ;;  %v620_v10 = vpack.c.bf16 %v619_v8, %v619_v8  ;;  %1440 = vmatpush3.bf16.msra.mxu0 %v1609_v11  ;;  %v1610_v12 = vld [vmem:[%s2451_s5 + $0x8] sm:$0xff]   ;;  %v1612_v14 = vld [vmem:[%s2451_s5 + $0x18] sm:$0xff]   ;;  %v1613_v15 = vld [vmem:[%s2453_s7] sm:$0xff]   ;;  %s2503_s23 = sld [smem:[#allocation30_spill]]  ;;  %s2504_s25 = sld [smem:[#allocation27_spill]]  ;;  %vm1174_vm3 = vcmask 130048  }
  0xff   : > { %1425 = vmatprep.subr.bf16.mxu1 %v1922_v0  ;;  %v623_v6 = vpack.c.bf16 %v622_v4, %v622_v4  ;;  %1441 = vmatprep.subr.bf16.mxu0 %v1922_v0  ;;  %v1614_v16 = vld [vmem:[%s2453_s7 + $0x8] sm:$0xff]   ;;  %v1615_v30 = vld [vmem:[%s2453_s7 + $0x10] sm:$0xff]   ;;  %v1616_v31 = vld [vmem:[%s2453_s7 + $0x18] sm:$0xff]   ;;  %s2505_s3 = sld [smem:[#allocation29_spill]]  ;;  %s2506_s22 = sld [smem:[#allocation31_spill]] }
 0x100   : > { %v1617_v32 = vld [vmem:[#allocation11] sm:$0xff]   ;;  %v1618_v33 = vld [vmem:[#allocation11 + $0x8] sm:$0xff]   ;;  %v1619_v42 = vld [vmem:[#allocation11 + $0x10] sm:$0xff]   ;;  %s1389_s10 = sshll.u32 %s2026_s24, 7  ;;  %s616_s14 = scalar_lea.vmem [#allocation14], %s2277_s11 }
 0x101   : > { %v1620_v43 = vld [vmem:[#allocation11 + $0x18] sm:$0xff]   ;;  %v1621_v44 = vld [vmem:[#allocation13] sm:$0xff]   ;;  %v1622_v45 = vld [vmem:[#allocation13 + $0x8] sm:$0xff]   ;;  %s1190_s27 = sshll.u32 %s616_s14, 4  ;;  %s1177_s24 = scalar_lea.sflag [#allocation4], %s2274_s8  ;;  %s2404_s27 = int_to_ptr.vmem [resolvable:$true] %s1190_s27 }
 0x102   : > { %1426 = vmatpush3.bf16.msra.mxu1 %v1606_v2  ;;  %1442 = vmatpush3.bf16.msra.mxu0 %v1610_v12  ;;  %v1357_v22 = vld [vmem:[%s2501_s4] ss:$0 sm:$0xff]  ;;  %v1623_v55 = vld [vmem:[#allocation13 + $0x10] sm:$0xff]   ;;  %s2507_s4 = sld [smem:[#allocation32_spill]]  ;;  %s1829_s11 = scalar_lea.vmem %s2404_s27, 128 }
 0x103   : > { %1431 = vmatprep.subr.bf16.mxu1 %v1922_v0  ;;  %1443 = vmatprep.subr.bf16.mxu0 %v1922_v0  ;;  %v1358_v34 = vld [vmem:[%s2502_s29] ss:$0 sm:$0xff]  ;;  %p1830_p3 = scmp.ne.s32.totalorder %s2404_s27, %s1829_s11  ;;  %p2508_p2 = scmp.ne.s32.totalorder %s2490_s15, 0 }
 0x104   : > { %v1364_v46 = vld [vmem:[#allocation10] ss:$0 sm:$0xff]  ;;  %v1626_v58 = vld [vmem:[%s2503_s23 + $0x8] sm:$0xff]   ;;  %v1627_v4 = vld [vmem:[%s2503_s23 + $0x10] sm:$0xff]   ;;  %s1924_s17 = smov [#allocation14]  }
 0x105   : > { %1428 = vmatmul.mubr.msk.bf16.vlgmr.msra.gmra.mrb[0].mxu1 %vm644_vm1, %v623_v6  ;;  %v1624_v56 = vld [vmem:[#allocation13 + $0x18] sm:$0xff]   ;;  %p1831_p6 = pnand %p1830_p3, %p2508_p2  ;;  %s1833_s28 = sshll.u32 %s1924_s17, 4  ;;  %s1834_s28 = int_to_ptr.vmem [resolvable:$false] %s1833_s28 }
 0x106   : > { %1432 = vmatpush3.bf16.msra.mxu1 %v1607_v7  ;;  %1435 = vmatprep.mubr.msk.bf16.mxu1 %vm1923_vm0, %v1922_v0  ;;  %v1625_v57 = vld [vmem:[%s2503_s23] sm:$0xff]   ;;  %v1628_v5 = vld [vmem:[%s2503_s23 + $0x18] sm:$0xff]   ;;  %s1835_s6 = scalar_lea.vmem %s1834_s28, 256  ;;  %p1836_p5 = scmp.lt.s32.totalorder %s2404_s27, %s1834_s28 }
 0x107   : > { %1433 = vmatprep.subr.bf16.mxu1 %v1922_v0  ;;  %1444 = vmatpush3.bf16.msra.mxu0 %v1611_v13  ;;  %v1370_v59 = vld [vmem:[%s2504_s25] ss:$0 sm:$0xff]  ;;  %p1832_p10 = pneg %p1831_p6  ;;  %p1837_p9 = scmp.lt.s32.totalorder %s1835_s6, %s1829_s11 }
 0x108   : > { %1445 = vmatprep.subr.bf16.mxu0 %v1922_v0  ;;  %v1376_v6 = vld [vmem:[%s2505_s3] ss:$0 sm:$0xff]  ;;  %s2402_s13 = scalar_lea.hbm %s2507_s4, %s1389_s10 }
 0x109   : > { %p1838_p0 = por %p1837_p9, %p1836_p5 }
 0x10a   : > { %1434 = vmatpush3.bf16.msra.mxu1 %v1608_v9 }
 0x10b   : > { %1451 = vmatprep.subr.bf16.mxu1 %v1922_v0  ;;  %1446 = vmatpush3.bf16.msra.mxu0 %v1612_v14  ;;  %p1839_p7 = pnand %p1838_p0, %p1832_p10 }
 0x10c   : > { %1463 = vmatprep.subr.bf16.mxu0 %v1922_v0 }
 0x10d   : > { %1436 = vmatmul.mubr.msk.bf16.vlgmr.msra.gmra.mrb[4].mxu1 %vm644_vm1, %v620_v10 }
 0x10e   : > { %1459 = vmatprep.mubr.msk.bf16.mxu1 %vm1923_vm0, %v1922_v0  ;;  %1452 = vmatpush3.bf16.msra.mxu1 %v1613_v15 }
 0x10f   : > { %1453 = vmatprep.subr.bf16.mxu1 %v1922_v0 }
 0x112   : > { %1454 = vmatpush3.bf16.msra.mxu1 %v1614_v16 }
 0x113   : > { %1455 = vmatprep.subr.bf16.mxu1 %v1922_v0 }
 0x116   : > { %1456 = vmatpush3.bf16.msra.mxu1 %v1615_v30 }
 0x117   : > { %1457 = vmatprep.subr.bf16.mxu1 %v1922_v0 }
 0x11a   : > { %1458 = vmatpush3.bf16.msra.mxu1 %v1616_v31 }
 0x11b   : > { %1475 = vmatprep.subr.bf16.mxu1 %v1922_v0 }
 0x1d8   : > { %v682_v17 = vpop.f32.mrb[0].mxu1 }
 0x1d9   : > { %v1429_v18 = vpop.f32.mrb[1].mxu1 }
 0x1da   : > { %v685_v19 = vpop.f32.mrb[2].mxu1 }
 0x1db   : > { %v1430_v20 = vpop.f32.mrb[3].mxu1 }
 0x1e0   : > { %v737_v21 = vpop.f32.mrb[4].mxu1 }
 0x1e1   : > { %v738_v23 = vadd.f32 %v737_v21, %v682_v17  ;;  %v1437_v24 = vpop.f32.mrb[5].mxu1 }
 0x1e2   : > { %v740_v25 = vpop.f32.mrb[6].mxu1 }
 0x1e3   : > { %v750_v26 = vadd.f32 %v1357_v22, %v738_v23  ;;  %v1438_v27 = vpop.f32.mrb[7].mxu1 }
 0x1e5   : > { %v751_v28 = vmax.f32 %v750_v26, 0.0 }
 0x1e7   : > { %v752_v29 = vpack.c.bf16 %v751_v28, %v751_v28 }
 0x1e9   : > { %1448 = vmatmul.mubr.msk.bf16.vlgmr.msra.gmra.mrb[0].mxu0 %vm792_vm2, %v752_v29 }
 0x1ea   : > { %1471 = vmatprep.mubr.msk.bf16.mxu0 %vm1923_vm0, %v1922_v0  ;;  %1464 = vmatpush3.bf16.msra.mxu0 %v1617_v32 }
 0x1eb   : > { %1465 = vmatprep.subr.bf16.mxu0 %v1922_v0 }
 0x1ee   : > { %1466 = vmatpush3.bf16.msra.mxu0 %v1618_v33 }
 0x1ef   : > { %1467 = vmatprep.subr.bf16.mxu0 %v1922_v0 }
 0x1f2   : > { %1468 = vmatpush3.bf16.msra.mxu0 %v1619_v42 }
 0x1f3   : > { %1469 = vmatprep.subr.bf16.mxu0 %v1922_v0 }
 0x1f6   : > { %1470 = vmatpush3.bf16.msra.mxu0 %v1620_v43 }
 0x1f7   : > { %1487 = vmatprep.subr.bf16.mxu0 %v1922_v0 }
 0x2bc   : > { %v830_v35 = vpop.f32.mrb[0].mxu0 }
 0x2bd   : > { %v831_v36 = vadd.f32 %v1358_v34, %v830_v35  ;;  %v1449_v37 = vpop.f32.mrb[1].mxu0 }
 0x2be   : > { %v833_v38 = vpop.f32.mrb[2].mxu0 }
 0x2bf   : > { %v836_v39 = vmax.f32 %v831_v36, 0.0  ;;  %v1450_v40 = vpop.f32.mrb[3].mxu0 }
 0x2c1   : > { %v837_v41 = vpack.c.bf16 %v836_v39, %v836_v39 }
 0x2c3   : > { %1460 = vmatmul.mubr.msk.bf16.vlgmr.msra.gmra.mrb[8].mxu1 %vm792_vm2, %v837_v41 }
 0x2c4   : > { %1483 = vmatprep.mubr.msk.bf16.mxu1 %vm1923_vm0, %v1922_v0  ;;  %1476 = vmatpush3.bf16.msra.mxu1 %v1621_v44 }
 0x2c5   : > { %1477 = vmatprep.subr.bf16.mxu1 %v1922_v0 }
 0x2c8   : > { %1478 = vmatpush3.bf16.msra.mxu1 %v1622_v45 }
 0x2c9   : > { %1479 = vmatprep.subr.bf16.mxu1 %v1922_v0 }
 0x2cc   : > { %1480 = vmatpush3.bf16.msra.mxu1 %v1623_v55 }
 0x2cd   : > { %1481 = vmatprep.subr.bf16.mxu1 %v1922_v0 }
 0x2d0   : > { %1482 = vmatpush3.bf16.msra.mxu1 %v1624_v56 }
 0x396   : > { %v914_v47 = vpop.f32.mrb[8].mxu1 }
 0x397   : > { %v915_v48 = vadd.f32 %v1364_v46, %v914_v47  ;;  %v1461_v49 = vpop.f32.mrb[9].mxu1 }
 0x398   : > { %v917_v50 = vpop.f32.mrb[10].mxu1 }
 0x399   : > { %v920_v51 = vadd.f32 %v915_v48, %v750_v26  ;;  %v1462_v52 = vpop.f32.mrb[11].mxu1 }
 0x39b   : > { %v921_v53 = vmax.f32 %v920_v51, 0.0 }
 0x39d   : > { %v922_v54 = vpack.c.bf16 %v921_v53, %v921_v53 }
 0x39f   : > { %1472 = vmatmul.mubr.msk.bf16.vlgmr.msra.gmra.mrb[4].mxu0 %vm792_vm2, %v922_v54 }
 0x3a0   : > { %1495 = vmatprep.mubr.msk.bf16.mxu0 %vm1923_vm0, %v1922_v0  ;;  %1488 = vmatpush3.bf16.msra.mxu0 %v1625_v57 }
 0x3a1   : > { %1489 = vmatprep.subr.bf16.mxu0 %v1922_v0 }
 0x3a4   : > { %1490 = vmatpush3.bf16.msra.mxu0 %v1626_v58 }
 0x3a5   : > { %1491 = vmatprep.subr.bf16.mxu0 %v1922_v0 }
 0x3a8   : > { %1492 = vmatpush3.bf16.msra.mxu0 %v1627_v4 }
 0x3a9   : > { %1493 = vmatprep.subr.bf16.mxu0 %v1922_v0  ;;  %v1382_v0 = vld [vmem:[%s2506_s22] ss:$0 sm:$0xff] }
 0x3ac   : > { %1494 = vmatpush3.bf16.msra.mxu0 %v1628_v5 }
 0x472   : > { %v999_v60 = vpop.f32.mrb[4].mxu0 }
 0x473   : > { %v1000_v61 = vadd.f32 %v1370_v59, %v999_v60  ;;  %v1473_v62 = vpop.f32.mrb[5].mxu0 }
 0x474   : > { %v1002_v63 = vpop.f32.mrb[6].mxu0 }
 0x475   : > { %v1005_v1 = vmax.f32 %v1000_v61, 0.0  ;;  %v1474_v2 = vpop.f32.mrb[7].mxu0 }
 0x477   : > { %v1006_v3 = vpack.c.bf16 %v1005_v1, %v1005_v1 }
 0x479   : > { %1484 = vmatmul.mubr.msk.bf16.vlgmr.msra.gmra.mrb[12].mxu1 %vm792_vm2, %v1006_v3 }
 0x54c   : > { %v1083_v7 = vpop.f32.mrb[12].mxu1 }
 0x54d   : > { %v1084_v8 = vadd.f32 %v1376_v6, %v1083_v7  ;;  %v1485_v9 = vpop.f32.mrb[13].mxu1 }
 0x54e   : > { %v1086_v10 = vpop.f32.mrb[14].mxu1 }
 0x54f   : > { %v1089_v11 = vadd.f32 %v1084_v8, %v920_v51  ;;  %v1486_v12 = vpop.f32.mrb[15].mxu1 }
 0x551   : > { %v1090_v13 = vmax.f32 %v1089_v11, 0.0 }
 0x553   : > { %v1091_v14 = vpack.c.bf16 %v1090_v13, %v1090_v13 }
 0x555   : > { %1496 = vmatmul.mubr.msk.bf16.vlgmr.msra.gmra.mrb[8].mxu0 %vm792_vm2, %v1091_v14 }
 0x628   : > { %v1168_v15 = vpop.f32.mrb[8].mxu0 }
 0x629   : > { %v1169_v16 = vadd.f32 %v1382_v0, %v1168_v15  ;;  %v1497_v17 = vpop.f32.mrb[9].mxu0 }
 0x62a   : > { %v1171_v18 = vpop.f32.mrb[10].mxu0 }
 0x62b   : > { %v1498_v19 = vpop.f32.mrb[11].mxu0  ;;  %1175 = vst.msk [vmem:[%s616_s14] sm:$0xff] %vm1174_vm3, %v1169_v16 }
 0x62c   : > { %1842 = shalt.err (!%p1839_p7)
}
 0x62d   : > { %s1843_s8 = scalar_lea.hbm %s2402_s13, 128  ;;  %s1847_s29 = scalar_lea.hbm %s2507_s4, 256 }
 0x62e   : > { %p1844_p11 = scmp.ne.s32.totalorder %s2402_s13, %s1843_s8  ;;  %p1848_p12 = scmp.lt.u32.totalorder %s2402_s13, %s2507_s4 }
 0x62f   : > { %p1849_p13 = scmp.lt.u32.totalorder %s1847_s29, %s1843_s8  ;;  %p1851_p3 = scmp.lt.u32.totalorder %s1843_s8, %s2402_s13 }
 0x630   : > { %p1845_p8 = pnand %p1844_p11, %p2508_p2 }
 0x631   : > { %p1850_p1 = por %p1849_p13, %p1848_p12 }
 0x632   : > { %p1846_p4 = pneg %p1845_p8 }
 0x633   : > { %p1852_p6 = por %p1851_p3, %p1850_p1 }
 0x635   : > { %p1853_p10 = pnand %p1852_p6, %p1846_p4 }
 0x637   : > { %1856 = shalt.err (!%p1853_p10)
}
 0x638   : > { %1523 = dma.vmem_to_hbm [thread:$0]  (%p2508_p2), %s2404_s27, 128, %s2402_s13, %s1177_s24  }
 0x639 PF: > { %s1202_s10 = sand.u32 1, %s1899_s18   ;;  %p2509_p5 = scmp.ne.s32.totalorder %s2491_s16, 0 }
 0x63a   : > { %p2510_p9 = scmp.ge.s32.totalorder %s1911_s21, 2  ;;  %s1203_s14 = scalar_lea.sflag [#allocation4], %s1202_s10 }
 0x63c   : > { %p1549_p0 = pnand %p2510_p9, %p2509_p5 }
 0x63e   : > { %1894 = dma.done.wait (!%p1549_p0), %s1203_s14, 128  }
 0x63f   : > { %1896 = vsyncadd (!%p1549_p0), %s1203_s14, 4294967168  ;;  %p33_p7 = scmp.ge.s32.totalorder %s2175_s26, 4   ;;  %s2511_s18 = smov %s1903_s19 }
 0x640   : > { %s2512_s19 = smov %s1907_s20  ;;  %s2513_s20 = smov %s2187_s2 }
 0x641   : > { %s2514_s21 = smov %s2175_s26  ;;  %35 = sbr.rel (!%p33_p7) target bundleno = 22 (0x16), region = 158 }
 0x648   :  { %1208 = vsyncpa [#allocation3], 1 }
 0x649   :  { %1210 = vsyncpa [#allocation3 + $0x1], 1 }
 0x64a   :  { %1211 = vsyncpa [#allocation6], 1 }
 0x64b   :  { %1213 = vsyncpa [#allocation6 + $0x1], 1 }
 0x64c   :  { %1214 = vsyncpa [#allocation9], 1 }
 0x64d   :  { %1215 = vsyncpa [#allocation12], 1 }
 0x64e   :  { %1216 = vsyncpa [#allocation4], 1 }
 0x64f   :  { %1218 = vsyncpa [#allocation4 + $0x1], 1 }

</bundles_post_ra>
